<compile_context>
chip_gen: v7x
topology: tpu7x:2x2x1
jax: 0.10.0
libtpu: 0.0.40
codegen_flags: <defaults>
</compile_context>

<pallas_src>
import functools
import math

import jax
import jax.numpy as jnp
from jax.experimental import pallas as pl
from jax.experimental.pallas import tpu as pltpu


def _xattn_kernel(q_ref, kv_ref,
                  wq_ref, bq_ref,
                  wkv_ref, bkv_ref,
                  wo_ref, bo_ref,
                  o_ref,
                  *, batch_block, num_q, num_kv, num_heads, head_dim, scale):
    bb, Nq, Nkv, H, Dh = batch_block, num_q, num_kv, num_heads, head_dim
    hdim = H * Dh

    q2 = q_ref[...]     # (bb*Nq,  Dq)   batch block folded into rows
    kv2 = kv_ref[...]   # (bb*Nkv, Dkv)

    # ---- Wide 2-D projections: M = bb*N rows, full hdim / 2*hdim output lanes.
    Q2 = jnp.dot(q2, wq_ref[...], preferred_element_type=jnp.float32) + bq_ref[...]
    KV2 = jnp.dot(kv2, wkv_ref[...], preferred_element_type=jnp.float32) + bkv_ref[...]

    # Fold the 1/sqrt(Dh) score scale into Q once (cheaper than scaling every
    # per-head (Nq, Nkv) score tile).
    Q2 = Q2 * scale

    # Unflatten the row dimension only (sublane-aligned: Nq/Nkv are multiples
    # of 8 or bb == 1); heads stay packed in the lane dimension.
    Q3 = Q2.reshape(bb, Nq, hdim)          # (bb, Nq,  hdim)
    KV3 = KV2.reshape(bb, Nkv, 2 * hdim)   # (bb, Nkv, 2*hdim) = [K | V]

    # ---- Per-head attention: heads are split only here (score/PV stage).
    head_outs = []
    for h in range(H):
        q_h = Q3[:, :, h * Dh:(h + 1) * Dh]                      # (bb, Nq,  Dh)
        k_h = KV3[:, :, h * Dh:(h + 1) * Dh]                     # (bb, Nkv, Dh)
        v_h = KV3[:, :, hdim + h * Dh: hdim + (h + 1) * Dh]      # (bb, Nkv, Dh)

        # Scores contract the last dims directly (no explicit K transpose).
        s = jnp.einsum("bqd,bkd->bqk", q_h, k_h,
                       preferred_element_type=jnp.float32)       # (bb, Nq, Nkv)
        m = jnp.max(s, axis=-1, keepdims=True)
        p = jnp.exp(s - m)
        denom = jnp.sum(p, axis=-1, keepdims=True)               # (bb, Nq, 1)

        # Deferred normalization: unnormalized PV matmul, scale the (smaller)
        # (Nq, Dh) result; EUP approx reciprocal overlaps the MXU push.
        o_h = jnp.einsum("bqk,bkd->bqd", p, v_h,
                         preferred_element_type=jnp.float32)     # (bb, Nq, Dh)
        head_outs.append(o_h * pl.reciprocal(denom, approx=True))

    o3 = jnp.concatenate(head_outs, axis=-1) if H > 1 else head_outs[0]
    o2 = o3.reshape(bb * Nq, hdim)                               # (bb*Nq, hdim)

    # ---- Output projection: ONE wide matmul contracting the full hdim.
    y = jnp.dot(o2, wo_ref[...], preferred_element_type=jnp.float32) + bo_ref[...]
    o_ref[...] = y.astype(o_ref.dtype)                           # (bb*Nq, Dq)


def tensor_cross_attention(query, key_value, params, *, num_heads,
                           batch_block=None):
    """Full TensorCrossAttention forward in one Pallas kernel."""
    B, Nq, Dq = query.shape
    B2, Nkv, Dkv = key_value.shape
    assert B == B2
    H = num_heads
    hdim = params["wq"].shape[1]
    Dh = hdim // H

    if batch_block is None:
        # Heuristic: fatten the matmul M dim (bb*Nq) toward >=128 rows, but
        # keep at least 2 grid steps when possible (both v7x TensorCores).
        bb = max(1, min(B, 128 // max(Nq, 1)))
        if B >= 2:
            bb = min(bb, B // 2)
        while B % bb:
            bb -= 1
        batch_block = bb
    bb = batch_block
    assert B % bb == 0, "batch must be divisible by batch_block"

    # ---- host-side (XLA) packing: NO replication across bb or H ----
    wkv = jnp.concatenate([params["wk"], params["wv"]], axis=-1)       # (Dkv, 2*hdim)
    bkv = jnp.concatenate([params["bk"], params["bv"]], axis=-1).reshape(1, 2 * hdim)
    bq2 = params["bq"].reshape(1, hdim)
    bo2 = params["bo"].reshape(1, Dq)

    # Lane-dense 2-D activation/output slabs (free wrapper reshapes).
    q2d = query.reshape(B * Nq, Dq)
    kv2d = key_value.reshape(B * Nkv, Dkv)

    kernel = functools.partial(
        _xattn_kernel, batch_block=bb, num_q=Nq, num_kv=Nkv,
        num_heads=H, head_dim=Dh, scale=1.0 / math.sqrt(Dh))

    # Weights/biases: full-array blocks with a constant index_map (re-used
    # every grid step).
    # TODO(synk): at production weight sizes mark these pipeline_mode=pl.Buffered(1)
    # to single-buffer them; at a few KiB each the double-buffer cost is noise here.
    full2 = lambda shape: pl.BlockSpec(shape, lambda i: (0, 0))

    out2d = pl.pallas_call(
        kernel,
        out_shape=jax.ShapeDtypeStruct((B * Nq, Dq), query.dtype),
        grid=(B // bb,),
        in_specs=[
            pl.BlockSpec((bb * Nq, Dq), lambda i: (i, 0)),        # query rows
            pl.BlockSpec((bb * Nkv, Dkv), lambda i: (i, 0)),      # key/value rows
            full2((Dq, hdim)), full2((1, hdim)),                  # Wq, bq
            full2((Dkv, 2 * hdim)), full2((1, 2 * hdim)),         # Wk|Wv, bk|bv
            full2((hdim, Dq)), full2((1, Dq)),                    # Wo, bo
        ],
        out_specs=pl.BlockSpec((bb * Nq, Dq), lambda i: (i, 0)),
        compiler_params=pltpu.CompilerParams(
            dimension_semantics=("parallel",)),
    )(q2d, kv2d, params["wq"], bq2, wkv, bkv, params["wo"], bo2)

    return out2d.reshape(B, Nq, Dq)


def _reference(query, key_value, params, *, num_heads):
    """Pure-JAX reference mirroring the PyTorch forward semantics."""
    B, Nq, Dq = query.shape
    _, Nkv, _ = key_value.shape
    Dh = Dq // num_heads
    Q = (query @ params["wq"] + params["bq"]).reshape(B, Nq, num_heads, Dh)
    K = (key_value @ params["wk"] + params["bk"]).reshape(B, Nkv, num_heads, Dh)
    V = (key_value @ params["wv"] + params["bv"]).reshape(B, Nkv, num_heads, Dh)
    Q, K, V = (jnp.transpose(t, (0, 2, 1, 3)) for t in (Q, K, V))
    s = jnp.einsum("bhqd,bhkd->bhqk", Q, K) / math.sqrt(Dh)
    w = jax.nn.softmax(s, axis=-1)
    o = jnp.einsum("bhqk,bhkd->bhqd", w, V)
    o = jnp.transpose(o, (0, 2, 1, 3)).reshape(B, Nq, num_heads * Dh)
    return o @ params["wo"] + params["bo"]


if __name__ == "__main__":
    # Small deterministic problem consistent with the module's forward.
    B, Nq, Nkv = 2, 8, 8
    Dq, Dkv = 32, 48          # query_feature_dim, key_value_feature_dim
    H = 4                     # attention_heads
    Dh = Dq // H
    hdim = H * Dh

    key = jax.random.PRNGKey(0)
    keys = jax.random.split(key, 10)

    query = jax.random.normal(keys[0], (B, Nq, Dq), dtype=jnp.float32)
    key_value = jax.random.normal(keys[1], (B, Nkv, Dkv), dtype=jnp.float32)

    params = {
        "wq": jax.random.normal(keys[2], (Dq, hdim), dtype=jnp.float32) * 0.1,
        "bq": jax.random.normal(keys[3], (hdim,), dtype=jnp.float32) * 0.1,
        "wk": jax.random.normal(keys[4], (Dkv, hdim), dtype=jnp.float32) * 0.1,
        "bk": jax.random.normal(keys[5], (hdim,), dtype=jnp.float32) * 0.1,
        "wv": jax.random.normal(keys[6], (Dkv, hdim), dtype=jnp.float32) * 0.1,
        "bv": jax.random.normal(keys[7], (hdim,), dtype=jnp.float32) * 0.1,
        "wo": jax.random.normal(keys[8], (hdim, Dq), dtype=jnp.float32) * 0.1,
        "bo": jax.random.normal(keys[9], (Dq,), dtype=jnp.float32) * 0.1,
    }

    ref = _reference(query, key_value, params, num_heads=H)

    # v7x-style: 2 parallel grid steps (one batch element per step, both TCs).
    out_p = jax.block_until_ready(
        tensor_cross_attention(query, key_value, params, num_heads=H,
                               batch_block=1))

    # v5e/v6e-style: collapsed batch (single grid step, bb*Nq = 16 matmul rows).
    out_c = jax.block_until_ready(
        tensor_cross_attention(query, key_value, params, num_heads=H,
                               batch_block=B))

    assert out_p.shape == (B, Nq, Dq)
    assert out_c.shape == (B, Nq, Dq)
    # Tolerance loosened slightly vs the f32 reference because the softmax uses
    # the EUP approximate reciprocal.
    assert jnp.allclose(out_p, ref, atol=2e-3, rtol=2e-3), "mismatch (parallel grid)"
    assert jnp.allclose(out_c, ref, atol=2e-3, rtol=2e-3), "mismatch (collapsed grid)"

    print("KERNEL_OK")
</pallas_src>

<mosaic_0001>
module attributes {stable_mosaic.version = 11 : i64} {
  func.func @_xattn_kernel(%arg0: i32, %arg1: memref<8x32xf32, #tpu.memory_space<vmem>>, %arg2: memref<8x48xf32, #tpu.memory_space<vmem>>, %arg3: memref<32x32xf32, #tpu.memory_space<vmem>>, %arg4: memref<1x32xf32, #tpu.memory_space<vmem>>, %arg5: memref<48x64xf32, #tpu.memory_space<vmem>>, %arg6: memref<1x64xf32, #tpu.memory_space<vmem>>, %arg7: memref<32x32xf32, #tpu.memory_space<vmem>>, %arg8: memref<1x32xf32, #tpu.memory_space<vmem>>, %arg9: memref<8x32xf32, #tpu.memory_space<vmem>>) attributes {dimension_semantics = [#tpu.dimension_semantics<parallel>], iteration_bounds = array<i64: 2>, scalar_prefetch = 0 : i64, scratch_operands = 0 : i64, tpu.core_type = #tpu.core_type<tc>, window_params = [{transform_indices = @transform_0, window_bounds = array<i64: 8, 32>}, {transform_indices = @transform_1, window_bounds = array<i64: 8, 48>}, {pipeline_mode = #tpu.pipeline_mode<synchronous>, transform_indices = @transform_2, window_bounds = array<i64: 32, 32>}, {pipeline_mode = #tpu.pipeline_mode<synchronous>, transform_indices = @transform_3, window_bounds = array<i64: 1, 32>}, {pipeline_mode = #tpu.pipeline_mode<synchronous>, transform_indices = @transform_4, window_bounds = array<i64: 48, 64>}, {pipeline_mode = #tpu.pipeline_mode<synchronous>, transform_indices = @transform_5, window_bounds = array<i64: 1, 64>}, {pipeline_mode = #tpu.pipeline_mode<synchronous>, transform_indices = @transform_6, window_bounds = array<i64: 32, 32>}, {pipeline_mode = #tpu.pipeline_mode<synchronous>, transform_indices = @transform_7, window_bounds = array<i64: 1, 32>}, {transform_indices = @transform_8, window_bounds = array<i64: 8, 32>}]} {
    %c0 = arith.constant 0 : index
    %c0_0 = arith.constant 0 : index
    %0 = vector.load %arg1[%c0, %c0_0] : memref<8x32xf32, #tpu.memory_space<vmem>>, vector<8x32xf32>
    %c0_1 = arith.constant 0 : index
    %c0_2 = arith.constant 0 : index
    %1 = vector.load %arg2[%c0_1, %c0_2] : memref<8x48xf32, #tpu.memory_space<vmem>>, vector<8x48xf32>
    %c0_3 = arith.constant 0 : index
    %c0_4 = arith.constant 0 : index
    %2 = vector.load %arg3[%c0_3, %c0_4] : memref<32x32xf32, #tpu.memory_space<vmem>>, vector<32x32xf32>
    %cst = arith.constant dense<0.000000e+00> : vector<8x32xf32>
    %3 = tpu.matmul %0, %2, %cst {dimension_numbers = #tpu.dot_dimension_numbers<[1], [0], [0], [1], [0, 0, 1, 1], [], []>} : vector<8x32xf32>, vector<32x32xf32>, vector<8x32xf32> -> vector<8x32xf32>
    %c0_5 = arith.constant 0 : index
    %c0_6 = arith.constant 0 : index
    %4 = vector.load %arg4[%c0_5, %c0_6] : memref<1x32xf32, #tpu.memory_space<vmem>>, vector<1x32xf32>
    %5 = vector.broadcast %4 : vector<1x32xf32> to vector<8x32xf32>
    %6 = arith.addf %3, %5 : vector<8x32xf32>
    %c0_7 = arith.constant 0 : index
    %c0_8 = arith.constant 0 : index
    %7 = vector.load %arg5[%c0_7, %c0_8] : memref<48x64xf32, #tpu.memory_space<vmem>>, vector<48x64xf32>
    %cst_9 = arith.constant dense<0.000000e+00> : vector<8x64xf32>
    %8 = tpu.matmul %1, %7, %cst_9 {dimension_numbers = #tpu.dot_dimension_numbers<[1], [0], [0], [1], [0, 0, 1, 1], [], []>} : vector<8x48xf32>, vector<48x64xf32>, vector<8x64xf32> -> vector<8x64xf32>
    %c0_10 = arith.constant 0 : index
    %c0_11 = arith.constant 0 : index
    %9 = vector.load %arg6[%c0_10, %c0_11] : memref<1x64xf32, #tpu.memory_space<vmem>>, vector<1x64xf32>
    %10 = vector.broadcast %9 : vector<1x64xf32> to vector<8x64xf32>
    %11 = arith.addf %8, %10 : vector<8x64xf32>
    %cst_12 = arith.constant 0.353553385 : f32
    %12 = vector.broadcast %cst_12 : f32 to vector<8x32xf32>
    %13 = arith.mulf %6, %12 : vector<8x32xf32>
    %14 = vector.shape_cast %13 : vector<8x32xf32> to vector<1x8x32xf32>
    %15 = vector.shape_cast %11 : vector<8x64xf32> to vector<1x8x64xf32>
    %16 = vector.extract_strided_slice %14 {offsets = [0, 0, 0], sizes = [1, 8, 8], strides = [1, 1, 1]} : vector<1x8x32xf32> to vector<1x8x8xf32>
    %17 = vector.extract_strided_slice %15 {offsets = [0, 0, 0], sizes = [1, 8, 8], strides = [1, 1, 1]} : vector<1x8x64xf32> to vector<1x8x8xf32>
    %18 = vector.extract_strided_slice %15 {offsets = [0, 0, 32], sizes = [1, 8, 8], strides = [1, 1, 1]} : vector<1x8x64xf32> to vector<1x8x8xf32>
    "tpu.trace_start"() <{level = 10 : i32, message = "bqd,bkd->bqk"}> : () -> ()
    %cst_13 = arith.constant dense<0.000000e+00> : vector<1x8x8xf32>
    %19 = tpu.matmul %16, %17, %cst_13 {dimension_numbers = #tpu.dot_dimension_numbers<[2], [2], [1], [1], [0, 0, 0, 1, 1, 1], [0], [0]>} : vector<1x8x8xf32>, vector<1x8x8xf32>, vector<1x8x8xf32> -> vector<1x8x8xf32>
    "tpu.trace_stop"() : () -> ()
    %cst_14 = arith.constant dense<0xFF800000> : vector<1x8xf32>
    %20 = vector.multi_reduction <maximumf>, %19, %cst_14 [2] : vector<1x8x8xf32> to vector<1x8xf32>
    %21 = vector.shape_cast %20 : vector<1x8xf32> to vector<1x8x1xf32>
    %22 = vector.broadcast %21 : vector<1x8x1xf32> to vector<1x8x8xf32>
    %23 = arith.subf %19, %22 : vector<1x8x8xf32>
    %24 = math.exp %23 : vector<1x8x8xf32>
    %cst_15 = arith.constant dense<0.000000e+00> : vector<1x8xf32>
    %25 = vector.multi_reduction <add>, %24, %cst_15 [2] : vector<1x8x8xf32> to vector<1x8xf32>
    %26 = vector.shape_cast %25 : vector<1x8xf32> to vector<1x8x1xf32>
    "tpu.trace_start"() <{level = 10 : i32, message = "bqk,bkd->bqd"}> : () -> ()
    %cst_16 = arith.constant dense<0.000000e+00> : vector<1x8x8xf32>
    %27 = tpu.matmul %24, %18, %cst_16 {dimension_numbers = #tpu.dot_dimension_numbers<[2], [1], [1], [2], [0, 0, 0, 1, 1, 2], [0], [0]>} : vector<1x8x8xf32>, vector<1x8x8xf32>, vector<1x8x8xf32> -> vector<1x8x8xf32>
    "tpu.trace_stop"() : () -> ()
    %28 = tpu.reciprocal %26 {approx = true} : vector<1x8x1xf32> -> vector<1x8x1xf32>
    %29 = vector.broadcast %28 : vector<1x8x1xf32> to vector<1x8x8xf32>
    %30 = arith.mulf %27, %29 : vector<1x8x8xf32>
    %31 = vector.extract_strided_slice %14 {offsets = [0, 0, 8], sizes = [1, 8, 8], strides = [1, 1, 1]} : vector<1x8x32xf32> to vector<1x8x8xf32>
    %32 = vector.extract_strided_slice %15 {offsets = [0, 0, 8], sizes = [1, 8, 8], strides = [1, 1, 1]} : vector<1x8x64xf32> to vector<1x8x8xf32>
    %33 = vector.extract_strided_slice %15 {offsets = [0, 0, 40], sizes = [1, 8, 8], strides = [1, 1, 1]} : vector<1x8x64xf32> to vector<1x8x8xf32>
    "tpu.trace_start"() <{level = 10 : i32, message = "bqd,bkd->bqk"}> : () -> ()
    %cst_17 = arith.constant dense<0.000000e+00> : vector<1x8x8xf32>
    %34 = tpu.matmul %31, %32, %cst_17 {dimension_numbers = #tpu.dot_dimension_numbers<[2], [2], [1], [1], [0, 0, 0, 1, 1, 1], [0], [0]>} : vector<1x8x8xf32>, vector<1x8x8xf32>, vector<1x8x8xf32> -> vector<1x8x8xf32>
    "tpu.trace_stop"() : () -> ()
    %cst_18 = arith.constant dense<0xFF800000> : vector<1x8xf32>
    %35 = vector.multi_reduction <maximumf>, %34, %cst_18 [2] : vector<1x8x8xf32> to vector<1x8xf32>
    %36 = vector.shape_cast %35 : vector<1x8xf32> to vector<1x8x1xf32>
    %37 = vector.broadcast %36 : vector<1x8x1xf32> to vector<1x8x8xf32>
    %38 = arith.subf %34, %37 : vector<1x8x8xf32>
    %39 = math.exp %38 : vector<1x8x8xf32>
    %cst_19 = arith.constant dense<0.000000e+00> : vector<1x8xf32>
    %40 = vector.multi_reduction <add>, %39, %cst_19 [2] : vector<1x8x8xf32> to vector<1x8xf32>
    %41 = vector.shape_cast %40 : vector<1x8xf32> to vector<1x8x1xf32>
    "tpu.trace_start"() <{level = 10 : i32, message = "bqk,bkd->bqd"}> : () -> ()
    %cst_20 = arith.constant dense<0.000000e+00> : vector<1x8x8xf32>
    %42 = tpu.matmul %39, %33, %cst_20 {dimension_numbers = #tpu.dot_dimension_numbers<[2], [1], [1], [2], [0, 0, 0, 1, 1, 2], [0], [0]>} : vector<1x8x8xf32>, vector<1x8x8xf32>, vector<1x8x8xf32> -> vector<1x8x8xf32>
    "tpu.trace_stop"() : () -> ()
    %43 = tpu.reciprocal %41 {approx = true} : vector<1x8x1xf32> -> vector<1x8x1xf32>
    %44 = vector.broadcast %43 : vector<1x8x1xf32> to vector<1x8x8xf32>
    %45 = arith.mulf %42, %44 : vector<1x8x8xf32>
    %46 = vector.extract_strided_slice %14 {offsets = [0, 0, 16], sizes = [1, 8, 8], strides = [1, 1, 1]} : vector<1x8x32xf32> to vector<1x8x8xf32>
    %47 = vector.extract_strided_slice %15 {offsets = [0, 0, 16], sizes = [1, 8, 8], strides = [1, 1, 1]} : vector<1x8x64xf32> to vector<1x8x8xf32>
    %48 = vector.extract_strided_slice %15 {offsets = [0, 0, 48], sizes = [1, 8, 8], strides = [1, 1, 1]} : vector<1x8x64xf32> to vector<1x8x8xf32>
    "tpu.trace_start"() <{level = 10 : i32, message = "bqd,bkd->bqk"}> : () -> ()
    %cst_21 = arith.constant dense<0.000000e+00> : vector<1x8x8xf32>
    %49 = tpu.matmul %46, %47, %cst_21 {dimension_numbers = #tpu.dot_dimension_numbers<[2], [2], [1], [1], [0, 0, 0, 1, 1, 1], [0], [0]>} : vector<1x8x8xf32>, vector<1x8x8xf32>, vector<1x8x8xf32> -> vector<1x8x8xf32>
    "tpu.trace_stop"() : () -> ()
    %cst_22 = arith.constant dense<0xFF800000> : vector<1x8xf32>
    %50 = vector.multi_reduction <maximumf>, %49, %cst_22 [2] : vector<1x8x8xf32> to vector<1x8xf32>
    %51 = vector.shape_cast %50 : vector<1x8xf32> to vector<1x8x1xf32>
    %52 = vector.broadcast %51 : vector<1x8x1xf32> to vector<1x8x8xf32>
    %53 = arith.subf %49, %52 : vector<1x8x8xf32>
    %54 = math.exp %53 : vector<1x8x8xf32>
    %cst_23 = arith.constant dense<0.000000e+00> : vector<1x8xf32>
    %55 = vector.multi_reduction <add>, %54, %cst_23 [2] : vector<1x8x8xf32> to vector<1x8xf32>
    %56 = vector.shape_cast %55 : vector<1x8xf32> to vector<1x8x1xf32>
    "tpu.trace_start"() <{level = 10 : i32, message = "bqk,bkd->bqd"}> : () -> ()
    %cst_24 = arith.constant dense<0.000000e+00> : vector<1x8x8xf32>
    %57 = tpu.matmul %54, %48, %cst_24 {dimension_numbers = #tpu.dot_dimension_numbers<[2], [1], [1], [2], [0, 0, 0, 1, 1, 2], [0], [0]>} : vector<1x8x8xf32>, vector<1x8x8xf32>, vector<1x8x8xf32> -> vector<1x8x8xf32>
    "tpu.trace_stop"() : () -> ()
    %58 = tpu.reciprocal %56 {approx = true} : vector<1x8x1xf32> -> vector<1x8x1xf32>
    %59 = vector.broadcast %58 : vector<1x8x1xf32> to vector<1x8x8xf32>
    %60 = arith.mulf %57, %59 : vector<1x8x8xf32>
    %61 = vector.extract_strided_slice %14 {offsets = [0, 0, 24], sizes = [1, 8, 8], strides = [1, 1, 1]} : vector<1x8x32xf32> to vector<1x8x8xf32>
    %62 = vector.extract_strided_slice %15 {offsets = [0, 0, 24], sizes = [1, 8, 8], strides = [1, 1, 1]} : vector<1x8x64xf32> to vector<1x8x8xf32>
    %63 = vector.extract_strided_slice %15 {offsets = [0, 0, 56], sizes = [1, 8, 8], strides = [1, 1, 1]} : vector<1x8x64xf32> to vector<1x8x8xf32>
    "tpu.trace_start"() <{level = 10 : i32, message = "bqd,bkd->bqk"}> : () -> ()
    %cst_25 = arith.constant dense<0.000000e+00> : vector<1x8x8xf32>
    %64 = tpu.matmul %61, %62, %cst_25 {dimension_numbers = #tpu.dot_dimension_numbers<[2], [2], [1], [1], [0, 0, 0, 1, 1, 1], [0], [0]>} : vector<1x8x8xf32>, vector<1x8x8xf32>, vector<1x8x8xf32> -> vector<1x8x8xf32>
    "tpu.trace_stop"() : () -> ()
    %cst_26 = arith.constant dense<0xFF800000> : vector<1x8xf32>
    %65 = vector.multi_reduction <maximumf>, %64, %cst_26 [2] : vector<1x8x8xf32> to vector<1x8xf32>
    %66 = vector.shape_cast %65 : vector<1x8xf32> to vector<1x8x1xf32>
    %67 = vector.broadcast %66 : vector<1x8x1xf32> to vector<1x8x8xf32>
    %68 = arith.subf %64, %67 : vector<1x8x8xf32>
    %69 = math.exp %68 : vector<1x8x8xf32>
    %cst_27 = arith.constant dense<0.000000e+00> : vector<1x8xf32>
    %70 = vector.multi_reduction <add>, %69, %cst_27 [2] : vector<1x8x8xf32> to vector<1x8xf32>
    %71 = vector.shape_cast %70 : vector<1x8xf32> to vector<1x8x1xf32>
    "tpu.trace_start"() <{level = 10 : i32, message = "bqk,bkd->bqd"}> : () -> ()
    %cst_28 = arith.constant dense<0.000000e+00> : vector<1x8x8xf32>
    %72 = tpu.matmul %69, %63, %cst_28 {dimension_numbers = #tpu.dot_dimension_numbers<[2], [1], [1], [2], [0, 0, 0, 1, 1, 2], [0], [0]>} : vector<1x8x8xf32>, vector<1x8x8xf32>, vector<1x8x8xf32> -> vector<1x8x8xf32>
    "tpu.trace_stop"() : () -> ()
    %73 = tpu.reciprocal %71 {approx = true} : vector<1x8x1xf32> -> vector<1x8x1xf32>
    %74 = vector.broadcast %73 : vector<1x8x1xf32> to vector<1x8x8xf32>
    %75 = arith.mulf %72, %74 : vector<1x8x8xf32>
    %76 = tpu.concatenate %30, %45, %60, %75 in 2 : vector<1x8x8xf32>, vector<1x8x8xf32>, vector<1x8x8xf32>, vector<1x8x8xf32> -> vector<1x8x32xf32>
    %77 = vector.shape_cast %76 : vector<1x8x32xf32> to vector<8x32xf32>
    %c0_29 = arith.constant 0 : index
    %c0_30 = arith.constant 0 : index
    %78 = vector.load %arg7[%c0_29, %c0_30] : memref<32x32xf32, #tpu.memory_space<vmem>>, vector<32x32xf32>
    %cst_31 = arith.constant dense<0.000000e+00> : vector<8x32xf32>
    %79 = tpu.matmul %77, %78, %cst_31 {dimension_numbers = #tpu.dot_dimension_numbers<[1], [0], [0], [1], [0, 0, 1, 1], [], []>} : vector<8x32xf32>, vector<32x32xf32>, vector<8x32xf32> -> vector<8x32xf32>
    %c0_32 = arith.constant 0 : index
    %c0_33 = arith.constant 0 : index
    %80 = vector.load %arg8[%c0_32, %c0_33] : memref<1x32xf32, #tpu.memory_space<vmem>>, vector<1x32xf32>
    %81 = vector.broadcast %80 : vector<1x32xf32> to vector<8x32xf32>
    %82 = arith.addf %79, %81 : vector<8x32xf32>
    %c0_34 = arith.constant 0 : index
    %c0_35 = arith.constant 0 : index
    %83 = vector.load %arg9[%c0_34, %c0_35] : memref<8x32xf32, #tpu.memory_space<vmem>>, vector<8x32xf32>
    tpu.vector_store %arg9[%c0_34, %c0_35], %82 {strides = array<i32>} : memref<8x32xf32, #tpu.memory_space<vmem>>, vector<8x32xf32>,
    return
  }
  func.func @transform_0(%arg0: i32) -> (i32, i32) {
    %c0_i32 = arith.constant 0 : i32
    %c0_i32_0 = arith.constant 0 : i32
    return %arg0, %c0_i32 : i32, i32
  }
  func.func @transform_1(%arg0: i32) -> (i32, i32) {
    %c0_i32 = arith.constant 0 : i32
    %c0_i32_0 = arith.constant 0 : i32
    return %arg0, %c0_i32 : i32, i32
  }
  func.func @transform_2(%arg0: i32) -> (i32, i32) {
    %c0_i32 = arith.constant 0 : i32
    %c0_i32_0 = arith.constant 0 : i32
    %c0_i32_1 = arith.constant 0 : i32
    return %c0_i32, %c0_i32_0 : i32, i32
  }
  func.func @transform_3(%arg0: i32) -> (i32, i32) {
    %c0_i32 = arith.constant 0 : i32
    %c0_i32_0 = arith.constant 0 : i32
    %c0_i32_1 = arith.constant 0 : i32
    return %c0_i32, %c0_i32_0 : i32, i32
  }
  func.func @transform_4(%arg0: i32) -> (i32, i32) {
    %c0_i32 = arith.constant 0 : i32
    %c0_i32_0 = arith.constant 0 : i32
    %c0_i32_1 = arith.constant 0 : i32
    return %c0_i32, %c0_i32_0 : i32, i32
  }
  func.func @transform_5(%arg0: i32) -> (i32, i32) {
    %c0_i32 = arith.constant 0 : i32
    %c0_i32_0 = arith.constant 0 : i32
    %c0_i32_1 = arith.constant 0 : i32
    return %c0_i32, %c0_i32_0 : i32, i32
  }
  func.func @transform_6(%arg0: i32) -> (i32, i32) {
    %c0_i32 = arith.constant 0 : i32
    %c0_i32_0 = arith.constant 0 : i32
    %c0_i32_1 = arith.constant 0 : i32
    return %c0_i32, %c0_i32_0 : i32, i32
  }
  func.func @transform_7(%arg0: i32) -> (i32, i32) {
    %c0_i32 = arith.constant 0 : i32
    %c0_i32_0 = arith.constant 0 : i32
    %c0_i32_1 = arith.constant 0 : i32
    return %c0_i32, %c0_i32_0 : i32, i32
  }
  func.func @transform_8(%arg0: i32) -> (i32, i32) {
    %c0_i32 = arith.constant 0 : i32
    %c0_i32_0 = arith.constant 0 : i32
    return %arg0, %c0_i32 : i32, i32
  }
}

</mosaic_0001>

<bundles_post_ra>
// kernel: tpu_custom_call.1
= control target key start
LH: loop header
LB: loop body
LE: loop exit
PB: predicated region body
PF: predicated region fallthrough
CT: control target
= control target key end

     0   :  { %s2431_s0 = inlined_call_operand.hbm [shape: f32[16,32], index: 0, kind: input, shape index: {}]   ;;  %s2432_s1 = inlined_call_operand.hbm [shape: f32[16,48], index: 1, kind: input, shape index: {}]   ;;  %s2433_s2 = inlined_call_operand.hbm [shape: f32[32,32], index: 2, kind: input, shape index: {}]   ;;  %s2434_s3 = inlined_call_operand.vmem [shape: f32[1,32], index: 3, kind: input, shape index: {}]   ;;  %s2435_s4 = inlined_call_operand.hbm [shape: f32[48,64], index: 4, kind: input, shape index: {}]   ;;  %s2436_s5 = inlined_call_operand.vmem [shape: f32[1,64], index: 5, kind: input, shape index: {}]   ;;  %s2437_s6 = inlined_call_operand.hbm [shape: f32[32,32], index: 6, kind: input, shape index: {}]   ;;  %s2438_s7 = inlined_call_operand.vmem [shape: f32[1,32], index: 7, kind: input, shape index: {}]   ;;  %s2439_s8 = inlined_call_operand.hbm [shape: f32[16,32], index: 8, kind: output, shape index: {}]  }
   0x1   :  { %2446 = sst [smem:[#allocation19_spill]] %s2433_s2 }
   0x2   :  { %2447 = sst [smem:[#allocation20_spill]] %s2435_s4 }
   0x3   :  { %2448 = sst [smem:[#allocation21_spill]] %s2437_s6 }
   0x4   :  { %13 = vsyncpa [#allocation3], 0 }
   0x5   :  { %15 = vsyncpa [#allocation3 + $0x1], 0 }
   0x6   :  { %16 = vsyncpa [#allocation6], 0 }
   0x7   :  { %18 = vsyncpa [#allocation6 + $0x1], 0 }
   0x8   :  { %19 = vsyncpa [#allocation9], 0 }
   0x9   :  { %20 = vsyncpa [#allocation4], 0 }
   0xa   :  { %22 = vsyncpa [#allocation4 + $0x1], 0  ;;  %s2045_s27 = smov 0   ;;  %s2047_s28 = smov 0  }
   0xb   :  { %s2049_s29 = smov 0   ;;  %s2051_s30 = smov 0  }
   0xc LB: > { %2449 = sst [smem:[#allocation17_spill]] %s1965_s27  ;;  %s2066_s9 = sadd.s32 4294967295, %s1977_s30   ;;  %s1977_s30 = sphi %s2051_s30, %s2476_s30   ;;  %s1973_s29 = sphi %s2049_s29, %s2475_s29   ;;  %s1969_s28 = sphi %s2047_s28, %s2474_s28   ;;  %s1965_s27 = sphi %s2045_s27, %s2473_s27  }
   0xd   : > { %s1472_s10 = sadd.s32 4294967294, %s1977_s30   ;;  %p48_p0 = scmp.ne.s32.totalorder %s1969_s28, %s1965_s27 }
   0xe   : > { %p2440_p1 = scmp.eq.s32.totalorder %s2066_s9, 0  ;;  %p230_p3 = scmp.eq.s32.totalorder %s1472_s10, 1 }
   0xf   : > { %p1473_p5 = scmp.ge.s32.totalorder %s1977_s30, 1  ;;  %p237_p7 = scmp.lt.s32.totalorder %s1977_s30, 3 }
  0x10   : > { %p2075_p4 = por %p2440_p1, %p48_p0  ;;  %p2080_p6 = por %p230_p3, %p48_p0 }
  0x11   : > { %p2085_p8 = pnand %p1473_p5, %p237_p7  ;;  %s1979_s14 = smov [#allocation7]  }
  0x12   : > { %s2450_s11 = scalar_select %p2075_p4, 1, 0 }
  0x13   : > { %s2451_s12 = scalar_select %p2080_p6, 1, 0 }
  0x14   : > { %s2453_s13 = scalar_select %p2085_p8, 1, 0 }
  0x15   : > { %2452 = sst [smem:[#allocation18_spill]] %s2451_s12  ;;  %s249_s15 = sshll.u32 %s1979_s14, 4  ;;  %s2089_s15 = int_to_ptr.vmem [resolvable:$true] %s249_s15 }
  0x16   : > { %p1660_p9 = pneg %p2085_p8  ;;  %s1980_s17 = smov [#allocation8]  }
  0x17   : > { %s265_s18 = sshll.u32 %s1980_s17, 4  ;;  %s1981_s19 = smov [#allocation10]   ;;  %s2100_s18 = int_to_ptr.vmem [resolvable:$true] %s265_s18 }
  0x18   : > { %p2096_p11 = pnand %p1660_p9, %p2440_p1  ;;  %s2102_s20 = sshll.u32 %s1981_s19, 4  ;;  %s282_s20 = int_to_ptr.vmem [resolvable:$true] %s2102_s20 }
  0x19   : > { %s2455_s2 = sld [smem:[#allocation19_spill]] }
  0x1a   : > { %p2112_p13 = pneg %p2096_p11 }
  0x1f   : > { %s1755_s23 = scalar_lea.hbm %s2455_s2, 512 }
  0x20   : > { %p1756_p12 = scmp.ne.s32.totalorder %s2455_s2, %s1755_s23  ;;  %p1762_p5 = scmp.lt.u32.totalorder %s1755_s23, %s2455_s2 }
  0x22   : > { %p1758_p0 = pnand %p2112_p13, %p1756_p12 }
  0x24   : > { %p1759_p3 = pneg %p1758_p0 }
  0x26   : > { %p1764_p7 = pnand %p1762_p5, %p1759_p3 }
  0x28   : > { %1767 = shalt.err (!%p1764_p7)
}
  0x29   : > { %s1768_s17 = scalar_lea.vmem %s2089_s15, 512  ;;  %p1776_p2 = scmp.lt.s32.totalorder %s2089_s15, %s2089_s15 }
  0x2a   : > { %p1769_p9 = scmp.ne.s32.totalorder %s2089_s15, %s1768_s17  ;;  %p1777_p6 = scmp.lt.s32.totalorder %s1768_s17, %s1768_s17 }
  0x2c   : > { %p1771_p10 = pnand %p1769_p9, %p2112_p13  ;;  %p1778_p12 = por %p1777_p6, %p1776_p2 }
  0x2e   : > { %p1772_p1 = pneg %p1771_p10 }
  0x30   : > { %p1779_p0 = pnand %p1778_p12, %p1772_p1 }
  0x32   : > { %1782 = shalt.err (!%p1779_p0)
}
  0x33   : > { %s1982_s19 = smov 128   ;;  %s1983_s21 = smov 8  }
  0x34   : > { %1663 = dma.hbm_to_vmem [thread:$0]  (!%p2096_p11), %s2455_s2, 512, %s2089_s15, [#allocation6], %s1982_s19, %s1982_s19, %s1983_s21  }
  0x35   : > { %s2457_s4 = sld [smem:[#allocation20_spill]] }
  0x3b   : > { %s1783_s10 = scalar_lea.hbm %s2457_s4, 768 }
  0x3c   : > { %p1784_p1 = scmp.ne.s32.totalorder %s2457_s4, %s1783_s10  ;;  %p1790_p10 = scmp.lt.u32.totalorder %s1783_s10, %s2457_s4 }
  0x3e   : > { %p1786_p2 = pnand %p1784_p1, %p2112_p13 }
  0x40   : > { %p1787_p6 = pneg %p1786_p2 }
  0x42   : > { %p1792_p3 = pnand %p1790_p10, %p1787_p6 }
  0x44   : > { %1795 = shalt.err (!%p1792_p3)
}
  0x45   : > { %s1796_s15 = scalar_lea.vmem %s2100_s18, 768  ;;  %p1804_p12 = scmp.lt.s32.totalorder %s2100_s18, %s2100_s18 }
  0x46   : > { %p1797_p5 = scmp.ne.s32.totalorder %s2100_s18, %s1796_s15  ;;  %p1805_p0 = scmp.lt.s32.totalorder %s1796_s15, %s1796_s15 }
  0x48   : > { %p1799_p7 = pnand %p1797_p5, %p2112_p13  ;;  %p1806_p1 = por %p1805_p0, %p1804_p12 }
  0x4a   : > { %p1800_p9 = pneg %p1799_p7 }
  0x4c   : > { %p1807_p2 = pnand %p1806_p1, %p1800_p9 }
  0x4e   : > { %1810 = shalt.err (!%p1807_p2)
}
  0x4f   : > { %1666 = dma.hbm_to_vmem [thread:$0]  (!%p2096_p11), %s2457_s4, 768, %s2100_s18, [#allocation9], %s1982_s19, %s1982_s19, %s1983_s21  }
  0x50   : > { %s2458_s6 = sld [smem:[#allocation21_spill]] }
  0x56   : > { %s1811_s24 = scalar_lea.hbm %s2458_s6, 512 }
  0x57   : > { %p1812_p6 = scmp.ne.s32.totalorder %s2458_s6, %s1811_s24  ;;  %p1818_p5 = scmp.lt.u32.totalorder %s1811_s24, %s2458_s6 }
  0x59   : > { %p1814_p10 = pnand %p1812_p6, %p2112_p13 }
  0x5b   : > { %p1815_p3 = pneg %p1814_p10 }
  0x5d   : > { %p1820_p7 = pnand %p1818_p5, %p1815_p3 }
  0x5f   : > { %1823 = shalt.err (!%p1820_p7)
}
  0x60   : > { %s1824_s15 = scalar_lea.vmem %s282_s20, 512  ;;  %p1832_p1 = scmp.lt.s32.totalorder %s282_s20, %s282_s20 }
  0x61   : > { %p1825_p9 = scmp.ne.s32.totalorder %s282_s20, %s1824_s15  ;;  %p1833_p2 = scmp.lt.s32.totalorder %s1824_s15, %s1824_s15 }
  0x63   : > { %p1827_p12 = pnand %p1825_p9, %p2112_p13  ;;  %p1834_p4 = por %p1833_p2, %p1832_p1 }
  0x65   : > { %p1828_p0 = pneg %p1827_p12 }
  0x67   : > { %p1835_p8 = pnand %p1834_p4, %p1828_p0 }
  0x69   : > { %1838 = shalt.err (!%p1835_p8)
}
  0x6a   : > { %1669 = dma.hbm_to_vmem [thread:$0]  (!%p2096_p11), %s2458_s6, 512, %s282_s20, [#allocation9], %s1982_s19, %s1982_s19, %s1983_s21  }
  0x6b   : > { %s2185_s26 = sadd.s32 1, %s1977_s30   ;;  %s35_s12 = sadd.s32 1, %s1973_s29 }
  0x6c   : > { %s32_s16 = ssub.s32 %s1977_s30, %s2185_s26  ;;  %p42_p8 = scmp.ne.s32.totalorder %s1973_s29, %s1969_s28 }
  0x6d   : > { %p33_p4 = scmp.eq.s32.totalorder %s32_s16, 0  ;;  %p43_p13 = scmp.eq.s32.totalorder %s1977_s30, 0 }
  0x6e   : > { %p1684_p6 = scmp.lt.s32.totalorder %s1977_s30, 2  ;;  %p2459_p3 = scmp.eq.s32.totalorder %s2066_s9, 1 }
  0x6f   : > { %s2195_s22 = scalar_select %p33_p4, %s1973_s29, %s35_s12  }
  0x70   : > { %p44_p10 = por %p43_p13, %p42_p8  ;;  %p2199_p5 = por %p2459_p3, %p42_p8 }
  0x71   : > { %s298_s24 = sand.u32 1, %s1973_s29   ;;  %s1479_s25 = sshll.u32 %s1977_s30, 7 }
  0x72   : > { %s2460_s23 = scalar_select %p2199_p5, 1, 0 }
  0x73   : > { %s2205_s20 = sshll.u32 %s298_s24, 3  ;;  %s2210_s10 = scalar_lea.hbm %s2431_s0, %s1479_s25 }
  0x74   : > { %s302_s14 = scalar_lea.vmem [#allocation2], %s2205_s20  ;;  %p2213_p11 = pnand %p1684_p6, %p44_p10 }
  0x75   : > { %s309_s17 = sshll.u32 %s302_s14, 4  ;;  %s2222_s16 = scalar_lea.hbm %s2432_s1, %s1479_s25  ;;  %s2217_s17 = int_to_ptr.vmem [resolvable:$true] %s309_s17 }
  0x76   : > { %s299_s12 = scalar_lea.sflag [#allocation3], %s298_s24  ;;  %s1839_s19 = scalar_lea.hbm %s2210_s10, 128 }
  0x77   : > { %p1840_p7 = scmp.ne.s32.totalorder %s2210_s10, %s1839_s19  ;;  %p1841_p9 = pneg %p2213_p11 }
  0x78   : > { %s1844_s2 = scalar_lea.hbm %s2431_s0, 256  ;;  %p1845_p1 = scmp.lt.u32.totalorder %s2210_s10, %s2431_s0 }
  0x79   : > { %p1842_p12 = pnand %p1841_p9, %p1840_p7  ;;  %p1846_p2 = scmp.lt.u32.totalorder %s1844_s2, %s1839_s19 }
  0x7a   : > { %p1848_p8 = scmp.lt.u32.totalorder %s1839_s19, %s2210_s10 }
  0x7b   : > { %p1843_p0 = pneg %p1842_p12  ;;  %p1847_p4 = por %p1846_p2, %p1845_p1 }
  0x7d   : > { %p1849_p13 = por %p1848_p8, %p1847_p4 }
  0x7f   : > { %p1850_p6 = pnand %p1849_p13, %p1843_p0 }
  0x81   : > { %1853 = shalt.err (!%p1850_p6)
}
  0x82   : > { %s1854_s24 = scalar_lea.vmem %s2217_s17, 128  ;;  %s1984_s25 = smov [#allocation2]  }
  0x83   : > { %p1855_p10 = scmp.ne.s32.totalorder %s2217_s17, %s1854_s24  ;;  %s1859_s18 = sshll.u32 %s1984_s25, 4  ;;  %s1860_s18 = int_to_ptr.vmem [resolvable:$false] %s1859_s18 }
  0x84   : > { %s1861_s4 = scalar_lea.vmem %s1860_s18, 256  ;;  %p1862_p12 = scmp.lt.s32.totalorder %s2217_s17, %s1860_s18 }
  0x85   : > { %p1857_p3 = pnand %p1855_p10, %p1841_p9  ;;  %p1863_p1 = scmp.lt.s32.totalorder %s1861_s4, %s1854_s24 }
  0x87   : > { %p1858_p7 = pneg %p1857_p3  ;;  %p1864_p2 = por %p1863_p1, %p1862_p12 }
  0x89   : > { %p1865_p4 = pnand %p1864_p2, %p1858_p7 }
  0x8b   : > { %1868 = shalt.err (!%p1865_p4)
}
  0x8c   : > { %1673 = dma.hbm_to_vmem [thread:$0]  (!%p2213_p11), %s2210_s10, 128, %s2217_s17, %s299_s12  }
  0x8d   : > { %s316_s2 = sand.u32 1, %s1977_s30   ;;  %s320_s6 = scalar_lea.vmem [#allocation5], %s2205_s20 }
  0x8e   : > { %s327_s27 = sshll.u32 %s320_s6, 4  ;;  %s317_s19 = scalar_lea.sflag [#allocation6], %s316_s2  ;;  %s328_s27 = int_to_ptr.vmem [resolvable:$true] %s327_s27 }
  0x8f   : > { %s1869_s21 = scalar_lea.hbm %s2222_s16, 128  ;;  %s1874_s25 = scalar_lea.hbm %s2432_s1, 256 }
  0x90   : > { %p1870_p0 = scmp.ne.s32.totalorder %s2222_s16, %s1869_s21  ;;  %p1875_p6 = scmp.lt.u32.totalorder %s2222_s16, %s2432_s1 }
  0x91   : > { %p1876_p10 = scmp.lt.u32.totalorder %s1874_s25, %s1869_s21  ;;  %p1878_p7 = scmp.lt.u32.totalorder %s1869_s21, %s2222_s16 }
  0x92   : > { %p1872_p8 = pnand %p1870_p0, %p1841_p9 }
  0x93   : > { %p1877_p3 = por %p1876_p10, %p1875_p6 }
  0x94   : > { %p1873_p13 = pneg %p1872_p8 }
  0x95   : > { %p1879_p12 = por %p1878_p7, %p1877_p3 }
  0x97   : > { %p1880_p1 = pnand %p1879_p12, %p1873_p13 }
  0x99   : > { %1883 = shalt.err (!%p1880_p1)
}
  0x9a   : > { %s1884_s20 = scalar_lea.vmem %s328_s27, 128  ;;  %s1985_s10 = smov [#allocation5]  }
  0x9b   : > { %p1885_p2 = scmp.ne.s32.totalorder %s328_s27, %s1884_s20  ;;  %s1889_s17 = sshll.u32 %s1985_s10, 4  ;;  %s1890_s17 = int_to_ptr.vmem [resolvable:$false] %s1889_s17 }
  0x9c   : > { %s1891_s12 = scalar_lea.vmem %s1890_s17, 256  ;;  %p1892_p8 = scmp.lt.s32.totalorder %s328_s27, %s1890_s17 }
  0x9d   : > { %p1887_p4 = pnand %p1885_p2, %p1841_p9  ;;  %p1893_p5 = scmp.lt.s32.totalorder %s1891_s12, %s1884_s20 }
  0x9f   : > { %p1888_p0 = pneg %p1887_p4  ;;  %p1894_p6 = por %p1893_p5, %p1892_p8 }
  0xa1   : > { %p1895_p10 = pnand %p1894_p6, %p1888_p0 }
  0xa3   : > { %1898 = shalt.err (!%p1895_p10)
}
  0xa4   : > { %1676 = dma.hbm_to_vmem [thread:$0]  (!%p2213_p11), %s2222_s16, 128, %s328_s27, %s317_s19  }
  0xa5   : > { %p2462_p13 = scmp.ne.s32.totalorder %s2453_s13, 0 }
  0xa6   : > { %s2273_s2 = sand.u32 (!%p2462_p13), 1, %s1969_s28   ;;  %p2463_p5 = scmp.ne.s32.totalorder (!%p2462_p13), %s2450_s11, 0 }
  0xa7   : > { %336 = sbr.rel (%p2462_p13) target bundleno = 1469 (0x5bd), region = 52  ;;  %s2276_s6 = sshll.u32 (!%p2462_p13), %s2273_s2, 3 }
  0xa8   : > { %s339_s21 = scalar_lea.sflag (!%p2462_p13), [#allocation3], %s2273_s2  ;;  %s342_s14 = scalar_lea.vmem (!%p2462_p13), [#allocation2], %s2276_s6 }
  0xae   : > { %1944 = dma.done.wait (%p2463_p5), %s339_s21, 128  }
  0xaf   : > { %1946 = vsyncadd (%p2463_p5), %s339_s21, 4294967168  ;;  %s347_s13 = sand.u32 1, %s2066_s9   ;;  %s351_s16 = scalar_lea.vmem [#allocation5], %s2276_s6 }
  0xb0   : > { %s348_s15 = scalar_lea.sflag [#allocation6], %s347_s13 }
  0xb1   : > { %1948 = dma.done.wait (%p2463_p5), %s348_s15, 128  }
  0xb2   : > { %1950 = vsyncadd (%p2463_p5), %s348_s15, 4294967168  ;;  %p2464_p11 = scmp.eq.s32.totalorder %s2066_s9, 0 }
  0xb4   : > { %1952 = dma.done.wait (%p2464_p11), [#allocation6], 512   ;;  %p2465_p9 = pmov %p2464_p11 }
  0xb6   : > { %1954 = vsyncadd (%p2465_p9), [#allocation6], 4294966784  ;;  %p2466_p3 = pmov %p2465_p9 }
  0xb8   : > { %1956 = dma.done.wait (%p2466_p3), [#allocation9], 1280   ;;  %p2467_p7 = pmov %p2466_p3 }
  0xb9   : > { %v1986_v0 = vmov 0.0|0.0   ;;  %vm1987_vm0 = vmmov 0   ;;  %v1988_v1 = vmov 0.0   ;;  %v488_v2 = vld [vmem:[#allocation8] sm:$0xff]  ;;  %v489_v3 = vld [vmem:[#allocation8 + $0x8] sm:$0xff]  ;;  %v490_v4 = vld [vmem:[#allocation8 + $0x10] sm:$0xff] }
  0xba   : > { %1958 = vsyncadd (%p2467_p7), [#allocation9], 4294966016  ;;  %1627 = vmatprep.subr.bf16.mxu1 %v1986_v0  ;;  %1621 = vmatprep.subr.bf16.mxu0 %v1986_v0  ;;  %v1628_v5 = vpack.c.bf16 %v489_v3, %v488_v2  ;;  %v491_v6 = vld [vmem:[#allocation8 + $0x18] sm:$0xff]  ;;  %v403_v7 = vld [vmem:[#allocation7] sm:$0xff]  ;;  %vm414_vm1 = vcmask 261120   ;;  %vm501_vm2 = vcmask 392192  }
  0xbb   : > { %1567 = vmatprep.mubr.msk.f32.mxu1 %vm1987_vm0, %v1988_v1  ;;  %1552 = vmatprep.mubr.msk.f32.mxu0 %vm1987_vm0, %v1988_v1  ;;  %v404_v8 = vld [vmem:[#allocation7 + $0x8] sm:$0xff]  ;;  %v405_v10 = vld [vmem:[#allocation7 + $0x10] sm:$0xff]  ;;  %v1631_v11 = vpack.c.bf16 %v491_v6, %v490_v4  ;;  %v406_v12 = vld [vmem:[#allocation7 + $0x18] sm:$0xff]  ;;  %vm576_vm3 = vcmask 64512   ;;  %s1989_s25 = smov 112   ;;  %s1990_s18 = smov 120  }
  0xbc   : > { %v1622_v9 = vpack.c.bf16 %v404_v8, %v403_v7  ;;  %1629 = vmatpush3.bf16.msra.mxu1 %v1628_v5  ;;  %v492_v13 = vld [vmem:[#allocation8 + $0x20] sm:$0xff]  ;;  %v493_v14 = vld [vmem:[#allocation8 + $0x28] sm:$0xff]  ;;  %v1625_v15 = vpack.c.bf16 %v406_v12, %v405_v10  ;;  %v402_v18 = vld [vmem:[%s351_s16] sm:$0xff]  ;;  %s1991_s4 = smov 104   ;;  %s1992_s20 = smov 96   ;;  %vm1248_vm4 = vcmask 130048  }
  0xbd   : > { %1630 = vmatprep.subr.bf16.mxu1 %v1986_v0  ;;  %v1634_v16 = vpack.c.bf16 %v493_v14, %v492_v13  ;;  %v401_v17 = vld [vmem:[%s342_s14] sm:$0xff]  ;;  %s1993_s10 = smov 80   ;;  %s1994_s17 = smov 72   ;;  %v1253_v12 = vld [vmem:[#allocation10 + $0x8] sm:$0xff]  ;;  %vm1250_vm5 = vcmask 195584  }
  0xbe   : > { %1623 = vmatpush3.bf16.msra.mxu0 %v1622_v9  ;;  %v1489_v19 = vld [vmem:[%s2434_s3] ss:$0 sm:$0xff]  ;;  %s1995_s12 = smov 88   ;;  %s1996_s21 = smov 8  }
  0xbf   : > { %1624 = vmatprep.subr.bf16.mxu0 %v1986_v0  ;;  %v1491_v21 = vld [vmem:[%s2436_s5] ss:$0 sm:$0xff]  ;;  %s1997_s14 = smov 16   ;;  %s1998_s13 = smov 24  }
  0xc0   : > { %1632 = vmatpush3.bf16.msra.mxu1 %v1631_v11  ;;  %v1252_v11 = vld [vmem:[#allocation10] sm:$0xff]  ;;  %s1508_s11 = sshll.u32 %s2066_s9, 7  ;;  %s400_s27 = scalar_lea.vmem [#allocation11], %s2276_s6 }
  0xc1   : > { %1633 = vmatprep.subr.bf16.mxu1 %v1986_v0  ;;  %v1637_v14 = vpack.c.bf16 %v1253_v12, %v1252_v11  ;;  %s1351_s19 = sshll.u32 %s400_s27, 4  ;;  %p2468_p1 = scmp.ne.s32.totalorder %s2460_s23, 0  ;;  %s2388_s19 = int_to_ptr.vmem [resolvable:$true] %s1351_s19 }
  0xc2   : > { %1626 = vmatpush3.bf16.msra.mxu0 %v1625_v15  ;;  %v1255_v15 = vld [vmem:[#allocation10 + $0x18] sm:$0xff]  ;;  %s1999_s9 = smov [#allocation11]  }
  0xc3   : > { %1570 = vmatprep.subr.mxu0 %v1988_v1  ;;  %s1903_s6 = sshll.u32 %s1999_s9, 4  ;;  %s1904_s6 = int_to_ptr.vmem [resolvable:$false] %s1903_s6 }
  0xc4   : > { %1635 = vmatpush3.bf16.msra.mxu1 %v1634_v16  ;;  %p1906_p0 = scmp.lt.s32.totalorder %s2388_s19, %s1904_s6 }
  0xc5   : > { %1553 = vmatmul.mubr.msk.f32.vlgmr.msra.gmra.mrb[0].mxu0 %vm414_vm1, %v401_v17  ;;  %1580 = vmatprep.subr.mxu1 %v1988_v1 }
  0xc6   : > { %1572 = vmatprep.mubr.msk.f32.mxu0 %vm1987_vm0, %v1988_v1 }
  0xc7   : > { %1568 = vmatmul.mubr.msk.f32.vlgmr.msra.gmra.mrb[0].mxu1 %vm501_vm2, %v402_v18 }
  0xc8   : > { %1582 = vmatprep.mubr.msk.f32.mxu1 %vm1987_vm0, %v1988_v1 }
 0x198   : > { %v484_v20 = vpop.f32.mrb[0].mxu0 }
 0x199   : > { %v1554_v22 = vpop.f32.mrb[1].mxu0  ;;  %v485_v23 = vadd.f32 %v1489_v19, %v484_v20 }
 0x19a   : > { %v571_v24 = vpop.f32.mrb[0].mxu1 }
 0x19b   : > { %v2324_v25 = vadd.f32 %v1491_v21, %v571_v24  ;;  %v1569_v26 = vpop.f32.mrb[1].mxu1  ;;  %v575_v27 = vmul.f32 0.35355338, %v485_v23 }
 0x19d   : > { %907 = vrot.lane.b32.xlu1 %v2324_v25, %s1989_s25  ;;  %742 = vrot.lane.b32.xlu0 %v2324_v25, %s1990_s18 }
 0x19e   : > { %1571 = vmatpush3.xpose.msk.msra.mxu0 %vm576_vm3, %v2324_v25 }
 0x19f   : > { %1575 = vmatprep.subr.mxu0 %v1988_v1 }
 0x1a1   : > { %1573 = vmatmul.mubr.msk.f32.vlgmr.msra.gmra.mrb[2].mxu0 %vm576_vm3, %v575_v27  ;;  %905 = vrot.lane.b32.xlu1 %v575_v27, %s1989_s25 }
 0x1a2   : > { %740 = vrot.lane.b32.xlu0 %v575_v27, %s1990_s18  ;;  %1577 = vmatprep.mubr.msk.f32.mxu0 %vm1987_vm0, %v1988_v1  ;;  %s2386_s18 = scalar_lea.hbm %s2439_s8, %s1508_s11 }
 0x1a5   : > { %1070 = vrot.lane.b32.xlu1 %v575_v27, %s1991_s4 }
 0x1a6   : > { %1072 = vrot.lane.b32.xlu0 %v2324_v25, %s1991_s4  ;;  %s1338_s4 = scalar_lea.sflag [#allocation4], %s2273_s2 }
 0x1a9   : > { %662 = vrot.lane.b32.xlu1 %v2324_v25, %s1992_s20  ;;  %s1899_s20 = scalar_lea.vmem %s2388_s19, 128 }
 0x1aa   : > { %p1900_p12 = scmp.ne.s32.totalorder %s2388_s19, %s1899_s20 }
 0x1ac   : > { %p1901_p2 = pnand %p1900_p12, %p2468_p1 }
 0x1ae   : > { %p1902_p4 = pneg %p1901_p2 }
 0x20f   : > { %v908_v28 = vpop.permute.xlu1 %907  ;;  %v743_v29 = vpop.permute.xlu0 %742 }
 0x210   : > { %1581 = vmatpush3.xpose.msk.msra.mxu1 %vm576_vm3, %v743_v29 }
 0x211   : > { %1590 = vmatprep.subr.mxu1 %v1988_v1 }
 0x213   : > { %v906_v30 = vpop.permute.xlu1 %905 }
 0x214   : > { %v741_v31 = vpop.permute.xlu0 %740 }
 0x215   : > { %1583 = vmatmul.mubr.msk.f32.vlgmr.msra.gmra.mrb[2].mxu1 %vm576_vm3, %v741_v31 }
 0x216   : > { %1591 = vmatpush3.xpose.msk.msra.mxu1 %vm576_vm3, %v908_v28  ;;  %1592 = vmatprep.mubr.msk.f32.mxu1 %vm1987_vm0, %v1988_v1 }
 0x217   : > { %v1071_v32 = vpop.permute.xlu1 %1070  ;;  %1600 = vmatprep.subr.mxu1 %v1988_v1 }
 0x218   : > { %v1073_v33 = vpop.permute.xlu0 %1072 }
 0x219   : > { %1593 = vmatmul.mubr.msk.f32.vlgmr.msra.gmra.mrb[4].mxu1 %vm576_vm3, %v906_v30 }
 0x21a   : > { %1601 = vmatpush3.xpose.msk.msra.mxu1 %vm576_vm3, %v1073_v33  ;;  %1602 = vmatprep.mubr.msk.f32.mxu1 %vm1987_vm0, %v1988_v1 }
 0x21b   : > { %v663_v34 = vpop.permute.xlu1 %662  ;;  %1636 = vmatprep.subr.bf16.mxu1 %v1986_v0 }
 0x21c   : > { %1576 = vmatpush3.msra.mxu0 %v663_v34 }
 0x21d   : > { %1603 = vmatmul.mubr.msk.f32.vlgmr.msra.gmra.mrb[6].mxu1 %vm576_vm3, %v1071_v32  ;;  %1585 = vmatprep.subr.mxu0 %v1988_v1 }
 0x21e   : > { %1618 = vmatprep.mubr.msk.f32.mxu1 %vm1987_vm0, %v1988_v1  ;;  %1638 = vmatpush3.bf16.msra.mxu1 %v1637_v14 }
 0x21f   : > { %1639 = vmatprep.subr.bf16.mxu1 %v1986_v0 }
 0x274   : > { %v649_v35 = vpop.f32.mrb[2].mxu0 }
 0x275   : > { %v1574_v36 = vpop.f32.mrb[3].mxu0  ;;  %v653_v37 = vsel %vm576_vm3, %v649_v35, -inf }
 0x276   : > { %654 = vmax.xlane.f32.xlu0 %v653_v37 }
 0x2e8   : > { %v814_v38 = vpop.f32.mrb[2].mxu1 }
 0x2e9   : > { %v1584_v39 = vpop.f32.mrb[3].mxu1  ;;  %v818_v40 = vsel %vm576_vm3, %v814_v38, -inf }
 0x2ea   : > { %819 = vmax.xlane.f32.xlu1 %v818_v40 }
 0x2ec   : > { %v979_v41 = vpop.f32.mrb[4].mxu1 }
 0x2ed   : > { %v1594_v42 = vpop.f32.mrb[5].mxu1  ;;  %v983_v43 = vsel %vm576_vm3, %v979_v41, -inf }
 0x2ee   : > { %984 = vmax.xlane.f32.xlu0 %v983_v43 }
 0x2f0   : > { %v1144_v44 = vpop.f32.mrb[6].mxu1 }
 0x2f1   : > { %v1604_v45 = vpop.f32.mrb[7].mxu1  ;;  %v1148_v46 = vsel %vm576_vm3, %v1144_v44, -inf }
 0x2f2   : > { %1149 = vmax.xlane.f32.xlu0 %v1148_v46 }
 0x2fb   : > { %992 = vrot.lane.b32.xlu1 %v2324_v25, %s1993_s10  ;;  %s1905_s10 = scalar_lea.vmem %s1904_s6, 256 }
 0x2fc   : > { %p1907_p8 = scmp.lt.s32.totalorder %s1905_s10, %s1899_s20 }
 0x2fe   : > { %p1908_p6 = por %p1907_p8, %p1906_p0 }
 0x2ff   : > { %1157 = vrot.lane.b32.xlu1 %v2324_v25, %s1994_s17 }
 0x300   : > { %p1909_p10 = pnand %p1908_p6, %p1902_p4 }
 0x303   : > { %v655_v47 = vpop.xlane.xlu0 %654 }
 0x304   : > { %v656_v48 = vsub.f32 %v649_v35, %v655_v47 }
 0x306   : > { %v657_v49 = vmul.f32 1.442695, %v656_v48 }
 0x308   : > { %1739 = vpow2.f32 %v657_v49  ;;  %827 = vrot.lane.b32.xlu0 %v2324_v25, %s1995_s12 }
 0x312   : > { %v1740_v50 = vpop.eup %1739 }
 0x313   : > { %1578 = vmatmul.mubr.msk.f32.vlgmr.msra.gmra.mrb[4].mxu0 %vm576_vm3, %v1740_v50  ;;  %v659_v7 = vsel %vm576_vm3, %v1740_v50, 0.0 }
 0x314   : > { %1587 = vmatprep.mubr.msk.f32.mxu0 %vm1987_vm0, %v1988_v1 }
 0x377   : > { %v820_v51 = vpop.xlane.xlu1 %819 }
 0x378   : > { %v821_v52 = vsub.f32 %v814_v38, %v820_v51  ;;  %v1505_v38 = vld [vmem:[%s2438_s7] ss:$0 sm:$0xff] }
 0x37a   : > { %v822_v53 = vmul.f32 1.442695, %v821_v52 }
 0x37b   : > { %v985_v54 = vpop.xlane.xlu0 %984  ;;  %v993_v61 = vpop.permute.xlu1 %992 }
 0x37c   : > { %1741 = vpow2.f32 %v822_v53  ;;  %v986_v55 = vsub.f32 %v979_v41, %v985_v54 }
 0x37e   : > { %v987_v56 = vmul.f32 1.442695, %v986_v55 }
 0x37f   : > { %v1150_v57 = vpop.xlane.xlu0 %1149  ;;  %v1158_v3 = vpop.permute.xlu1 %1157 }
 0x380   : > { %1743 = vpow2.f32 %v987_v56  ;;  %v1151_v58 = vsub.f32 %v1144_v44, %v1150_v57 }
 0x382   : > { %v1152_v59 = vmul.f32 1.442695, %v1151_v58 }
 0x383   : > { %v828_v60 = vpop.permute.xlu0 %827 }
 0x384   : > { %1745 = vpow2.f32 %v1152_v59  ;;  %1586 = vmatpush3.msra.mxu0 %v828_v60 }
 0x385   : > { %1595 = vmatprep.subr.mxu0 %v1988_v1 }
 0x386   : > { %v1742_v62 = vpop.eup %1741 }
 0x387   : > { %1588 = vmatmul.mubr.msk.f32.vlgmr.msra.gmra.mrb[6].mxu0 %vm576_vm3, %v1742_v62  ;;  %v824_v63 = vsel %vm576_vm3, %v1742_v62, 0.0 }
 0x388   : > { %1596 = vmatpush3.msra.mxu0 %v993_v61  ;;  %825 = vadd.xlane.f32.xlu0 %v824_v63 }
 0x389   : > { %1597 = vmatprep.mubr.msk.f32.mxu0 %vm1987_vm0, %v1988_v1  ;;  %1605 = vmatprep.subr.mxu0 %v1988_v1 }
 0x38a   : > { %v1744_v2 = vpop.eup %1743 }
 0x38b   : > { %1598 = vmatmul.mubr.msk.f32.vlgmr.msra.gmra.mrb[8].mxu0 %vm576_vm3, %v1744_v2  ;;  %v989_v4 = vsel %vm576_vm3, %v1744_v2, 0.0 }
 0x38c   : > { %1606 = vmatpush3.msra.mxu0 %v1158_v3  ;;  %990 = vadd.xlane.f32.xlu1 %v989_v4 }
 0x38d   : > { %1607 = vmatprep.mubr.msk.f32.mxu0 %vm1987_vm0, %v1988_v1  ;;  %v1254_v1 = vld [vmem:[#allocation10 + $0x10] sm:$0xff] }
 0x38e   : > { %v1746_v5 = vpop.eup %1745  ;;  %v1640_v17 = vpack.c.bf16 %v1255_v15, %v1254_v1 }
 0x38f   : > { %1608 = vmatmul.mubr.msk.f32.vlgmr.msra.gmra.mrb[10].mxu0 %vm576_vm3, %v1746_v5  ;;  %v1154_v6 = vsel %vm576_vm3, %v1746_v5, 0.0 }
 0x390   : > { %1155 = vadd.xlane.f32.xlu0 %v1154_v6  ;;  %1641 = vmatpush3.bf16.msra.mxu1 %v1640_v17 }
 0x394   : > { %660 = vadd.xlane.f32.xlu0 %v659_v7 }
 0x3e6   : > { %v734_v8 = vpop.f32.mrb[4].mxu0 }
 0x3e7   : > { %v1579_v9 = vpop.f32.mrb[5].mxu0 }
 0x415   : > { %v826_v10 = vpop.xlane.xlu0 %825 }
 0x416   : > { %1747 = vrcp.f32 %v826_v10 }
 0x419   : > { %v991_v13 = vpop.xlane.xlu1 %990 }
 0x41a   : > { %1749 = vrcp.f32 %v991_v13 }
 0x41d   : > { %v1156_v16 = vpop.xlane.xlu0 %1155 }
 0x41e   : > { %1751 = vrcp.f32 %v1156_v16 }
 0x420   : > { %v1748_v18 = vpop.eup %1747 }
 0x421   : > { %v661_v29 = vpop.xlane.xlu0 %660 }
 0x422   : > { %1753 = vrcp.f32 %v661_v29 }
 0x424   : > { %v1750_v22 = vpop.eup %1749 }
 0x428   : > { %v1752_v26 = vpop.eup %1751 }
 0x42c   : > { %v1754_v30 = vpop.eup %1753 }
 0x42d   : > { %v739_v32 = vmul.f32 %v1754_v30, %v734_v8 }
 0x45a   : > { %v899_v19 = vpop.f32.mrb[6].mxu0 }
 0x45b   : > { %v904_v20 = vmul.f32 %v1748_v18, %v899_v19  ;;  %v1589_v21 = vpop.f32.mrb[7].mxu0 }
 0x45d   : > { %1236 = vrot.lane.b32.xlu1 %v904_v20, %s1996_s21 }
 0x45e   : > { %v1064_v23 = vpop.f32.mrb[8].mxu0 }
 0x45f   : > { %v1069_v24 = vmul.f32 %v1750_v22, %v1064_v23  ;;  %v1599_v25 = vpop.f32.mrb[9].mxu0 }
 0x461   : > { %1240 = vrot.lane.b32.xlu0 %v1069_v24, %s1997_s14 }
 0x462   : > { %v1229_v0 = vpop.f32.mrb[10].mxu0 }
 0x463   : > { %v1234_v27 = vmul.f32 %v1752_v26, %v1229_v0  ;;  %v1609_v28 = vpop.f32.mrb[11].mxu0 }
 0x465   : > { %1244 = vrot.lane.b32.xlu1 %v1234_v27, %s1998_s13 }
 0x4cf   : > { %v1237_v31 = vpop.permute.xlu1 %1236 }
 0x4d0   : > { %v1247_v34 = vsel %vm576_vm3, %v739_v32, %v1237_v31 }
 0x4d3   : > { %v1241_v33 = vpop.permute.xlu0 %1240 }
 0x4d4   : > { %v1249_v35 = vsel %vm1248_vm4, %v1247_v34, %v1241_v33 }
 0x4d7   : > { %v1245_v36 = vpop.permute.xlu1 %1244 }
 0x4d8   : > { %v1251_v37 = vsel %vm1250_vm5, %v1249_v35, %v1245_v36 }
 0x4d9   : > { %1619 = vmatmul.mubr.msk.f32.vlgmr.msra.gmra.mrb[8].mxu1 %vm414_vm1, %v1251_v37 }
 0x5ac   : > { %v1332_v39 = vpop.f32.mrb[8].mxu1 }
 0x5ad   : > { %v1333_v40 = vadd.f32 %v1505_v38, %v1332_v39  ;;  %v1620_v41 = vpop.f32.mrb[9].mxu1 }
 0x5af   : > { %1336 = vst.msk [vmem:[%s400_s27] sm:$0xff] %vm414_vm1, %v1333_v40 }
 0x5b0   : > { %1912 = shalt.err (!%p1909_p10)
}
 0x5b1   : > { %s1913_s2 = scalar_lea.hbm %s2386_s18, 128  ;;  %s1917_s21 = scalar_lea.hbm %s2439_s8, 256 }
 0x5b2   : > { %p1914_p13 = scmp.ne.s32.totalorder %s2386_s18, %s1913_s2  ;;  %p1918_p9 = scmp.lt.u32.totalorder %s2386_s18, %s2439_s8 }
 0x5b3   : > { %p1919_p3 = scmp.lt.u32.totalorder %s1917_s21, %s1913_s2  ;;  %p1921_p12 = scmp.lt.u32.totalorder %s1913_s2, %s2386_s18 }
 0x5b4   : > { %p1915_p5 = pnand %p1914_p13, %p2468_p1 }
 0x5b5   : > { %p1920_p7 = por %p1919_p3, %p1918_p9 }
 0x5b6   : > { %p1916_p11 = pneg %p1915_p5 }
 0x5b7   : > { %p1922_p2 = por %p1921_p12, %p1920_p7 }
 0x5b9   : > { %p1923_p4 = pnand %p1922_p2, %p1916_p11 }
 0x5bb   : > { %1926 = shalt.err (!%p1923_p4)
}
 0x5bc   : > { %1658 = dma.vmem_to_hbm [thread:$0]  (%p2468_p1), %s2388_s19, 128, %s2386_s18, %s1338_s4  }
 0x5bd PF: > { %s2469_s15 = sld [smem:[#allocation17_spill]]  ;;  %s2470_s16 = sld [smem:[#allocation18_spill]] }
 0x5be   : > { %p2472_p8 = scmp.ge.s32.totalorder %s1977_s30, 2 }
 0x5c3   : > { %s1363_s11 = sand.u32 1, %s2469_s15   ;;  %p2471_p0 = scmp.ne.s32.totalorder %s2470_s16, 0 }
 0x5c4   : > { %s1364_s27 = scalar_lea.sflag [#allocation4], %s1363_s11 }
 0x5c5   : > { %p1678_p6 = pnand %p2472_p8, %p2471_p0 }
 0x5c7   : > { %1960 = dma.done.wait (!%p1678_p6), %s1364_s27, 128  }
 0x5c8   : > { %1962 = vsyncadd (!%p1678_p6), %s1364_s27, 4294967168  ;;  %p25_p10 = scmp.ge.s32.totalorder %s2185_s26, 4   ;;  %s2473_s27 = smov %s1969_s28 }
 0x5c9   : > { %s2474_s28 = smov %s1973_s29  ;;  %s2475_s29 = smov %s2195_s22 }
 0x5ca   : > { %s2476_s30 = smov %s2185_s26  ;;  %27 = sbr.rel (!%p25_p10) target bundleno = 12 (0xc), region = 122 }
 0x5d1   :  { %1369 = vsyncpa [#allocation3], 1 }
 0x5d2   :  { %1371 = vsyncpa [#allocation3 + $0x1], 1 }
 0x5d3   :  { %1372 = vsyncpa [#allocation6], 1 }
 0x5d4   :  { %1374 = vsyncpa [#allocation6 + $0x1], 1 }
 0x5d5   :  { %1375 = vsyncpa [#allocation9], 1 }
 0x5d6   :  { %1376 = vsyncpa [#allocation4], 1 }
 0x5d7   :  { %1378 = vsyncpa [#allocation4 + $0x1], 1 }

</bundles_post_ra>
